<compile_context>
chip_gen: v5e
topology: v5e:2x2
jax: 0.10.0
libtpu: 0.0.40
codegen_flags: <defaults>
</compile_context>

<pallas_src>
import jax
import jax.numpy as jnp
from jax.experimental import pallas as pl
from jax.experimental.pallas import tpu as pltpu

LANE = 128  # vreg lane width (same on v5e/v6e/v7x)


def _round_up(a, b):
    return ((a + b - 1) // b) * b


def _sublane_rows(dtype):
    """Native sublane tile height for a dtype: 8 (32-bit), 16 (bf16), 32 (8-bit)."""
    return max(8, 32 // max(1, dtype.itemsize))


def _qadd_kernel(x_ref, y_ref, o_ref):
    """One grid step = one (block_rows, 128) lane-dense tile: promote + add on the VPU."""
    o_ref[...] = x_ref[...].astype(o_ref.dtype) + y_ref[...].astype(o_ref.dtype)


def qadd_forward(x, y, *, vmem_tile_budget_bytes=24 * 1024 * 1024,
                 min_pallas_bytes=256 * 1024):
    """Pallas implementation of QAdd.forward: out = x + y (elementwise)."""
    assert x.shape == y.shape, "QAdd expects equal shapes (no broadcasting used here)"
    out_dtype = jnp.result_type(x.dtype, y.dtype)
    orig_shape = x.shape
    total = int(x.size)

    itemsizes = (x.dtype.itemsize, y.dtype.itemsize, out_dtype.itemsize)
    total_bytes = total * sum(itemsizes)

    # Small-size fast path: custom-call launch + reshapes dominate below a few
    # hundred KiB; XLA's fused elementwise add is strictly faster there.
    if total == 0 or total_bytes < min_pallas_bytes:
        return x + y

    xf = x.reshape(-1)
    yf = y.reshape(-1)

    bulk_rows = total // LANE
    bulk = bulk_rows * LANE
    if bulk_rows == 0:
        # Fewer than 128 elements survive the fast path only if min_pallas_bytes=0.
        return x + y

    # --- choose the row tile -------------------------------------------------
    align = max(_sublane_rows(x.dtype), _sublane_rows(y.dtype),
                _sublane_rows(out_dtype))
    bytes_per_row = LANE * sum(itemsizes)
    # Double-buffered (x, y, out) tiles must fit the VMEM budget on every chip
    # generation (<=24 MiB with vmem_limit_bytes=32 MiB: safe on v5e/v6e/v7x).
    cap_rows = max(align,
                   (vmem_tile_budget_bytes // (2 * bytes_per_row)) // align * align)
    # Target >= 8 grid steps when the array is big enough so the pipeline can
    # hide input DMA behind the previous step's compute/writeback.
    target_rows = _round_up(max(1, -(-bulk_rows // 8)), align)
    block_rows = max(align, min(cap_rows, target_rows))
    if block_rows >= bulk_rows:
        block_rows = bulk_rows  # single full-extent block (allowed even if unaligned)

    grid_steps = pl.cdiv(bulk_rows, block_rows)
    # Prefer an even step count (v7x has 2 TensorCores sharing the "parallel"
    # grid axis); one-shot adjustment, never exceeds the original tile size.
    if grid_steps > 1 and grid_steps % 2 == 1:
        alt = _round_up(max(1, -(-bulk_rows // (grid_steps + 1))), align)
        if align <= alt <= block_rows and pl.cdiv(bulk_rows, alt) % 2 == 0:
            block_rows = alt
            grid_steps = pl.cdiv(bulk_rows, alt)

    # --- bulk: un-padded (bulk_rows, 128) view -------------------------------
    if bulk == total:
        x2 = xf.reshape(bulk_rows, LANE)
        y2 = yf.reshape(bulk_rows, LANE)
    else:
        x2 = jax.lax.slice(xf, (0,), (bulk,)).reshape(bulk_rows, LANE)
        y2 = jax.lax.slice(yf, (0,), (bulk,)).reshape(bulk_rows, LANE)

    cost = pl.CostEstimate(flops=bulk, transcendentals=0,
                           bytes_accessed=bulk * sum(itemsizes))

    out2 = pl.pallas_call(
        _qadd_kernel,
        out_shape=jax.ShapeDtypeStruct((bulk_rows, LANE), out_dtype),
        grid_spec=pltpu.PrefetchScalarGridSpec(
            num_scalar_prefetch=0,
            grid=(grid_steps,),
            in_specs=[
                pl.BlockSpec((block_rows, LANE), lambda i: (i, 0)),
                pl.BlockSpec((block_rows, LANE), lambda i: (i, 0)),
            ],
            out_specs=pl.BlockSpec((block_rows, LANE), lambda i: (i, 0)),
        ),
        compiler_params=pltpu.CompilerParams(
            dimension_semantics=("parallel",),
            vmem_limit_bytes=32 * 1024 * 1024,
        ),
        cost_estimate=cost,
    )(x2, y2)

    if bulk == total:
        return out2.reshape(orig_shape)

    # <128-element lane tail: tiny XLA add, then stitch (one output pass only,
    # cheaper than padding both inputs + slicing the whole output).
    tail_out = (xf[bulk:] + yf[bulk:]).astype(out_dtype)
    return jnp.concatenate([out2.reshape(-1), tail_out]).reshape(orig_shape)


if __name__ == "__main__":
    key = jax.random.PRNGKey(0)
    k1, k2, k3, k4 = jax.random.split(key, 4)

    # Shapes consistent with the module: elementwise add of two small tensors.
    N, C, H, W = 2, 4, 16, 16
    x = jax.random.normal(k1, (N, C, H, W), dtype=jnp.float32)
    y = jax.random.normal(k2, (N, C, H, W), dtype=jnp.float32)
    ref = x + y

    # 1) Force the Pallas path (min_pallas_bytes=0) on the module-scale shape.
    out = jax.block_until_ready(qadd_forward(x, y, min_pallas_bytes=0))
    assert out.shape == ref.shape and out.dtype == ref.dtype
    assert jnp.allclose(out, ref, atol=0.0, rtol=0.0)

    # 2) Default call (tiny tensor -> XLA fast path) must match too.
    out_fast = jax.block_until_ready(qadd_forward(x, y))
    assert jnp.allclose(out_fast, ref, atol=0.0, rtol=0.0)

    # 3) Ragged size (not a multiple of 128): bulk kernel + tiny lane tail.
    x3 = jax.random.normal(k3, (3, 5, 37), dtype=jnp.float32)
    y3 = jax.random.normal(k4, (3, 5, 37), dtype=jnp.float32)
    out3 = jax.block_until_ready(qadd_forward(x3, y3, min_pallas_bytes=0))
    assert jnp.allclose(out3, x3 + y3, atol=0.0, rtol=0.0)

    # 4) bf16 (packed 16-sublane tiles) through the Pallas path.
    xb, yb = x.astype(jnp.bfloat16), y.astype(jnp.bfloat16)
    outb = jax.block_until_ready(qadd_forward(xb, yb, min_pallas_bytes=0))
    assert outb.dtype == jnp.bfloat16
    assert jnp.allclose(outb.astype(jnp.float32), (xb + yb).astype(jnp.float32))

    print("KERNEL_OK")
</pallas_src>

<mosaic_0001>
module attributes {stable_mosaic.version = 11 : i64} {
  func.func @_qadd_kernel(%arg0: i32, %arg1: memref<8x128xf32, #tpu.memory_space<vmem>>, %arg2: memref<8x128xf32, #tpu.memory_space<vmem>>, %arg3: memref<8x128xf32, #tpu.memory_space<vmem>>) attributes {dimension_semantics = [#tpu.dimension_semantics<parallel>], iteration_bounds = array<i64: 2>, scalar_prefetch = 0 : i64, scratch_operands = 0 : i64, tpu.core_type = #tpu.core_type<tc>, window_params = [{transform_indices = @transform_0, window_bounds = array<i64: 8, 128>}, {transform_indices = @transform_1, window_bounds = array<i64: 8, 128>}, {transform_indices = @transform_2, window_bounds = array<i64: 8, 128>}]} {
    %c0 = arith.constant 0 : index
    %c0_0 = arith.constant 0 : index
    %0 = vector.load %arg1[%c0, %c0_0] : memref<8x128xf32, #tpu.memory_space<vmem>>, vector<8x128xf32>
    %c0_1 = arith.constant 0 : index
    %c0_2 = arith.constant 0 : index
    %1 = vector.load %arg2[%c0_1, %c0_2] : memref<8x128xf32, #tpu.memory_space<vmem>>, vector<8x128xf32>
    %2 = arith.addf %0, %1 : vector<8x128xf32>
    %c0_3 = arith.constant 0 : index
    %c0_4 = arith.constant 0 : index
    %3 = vector.load %arg3[%c0_3, %c0_4] : memref<8x128xf32, #tpu.memory_space<vmem>>, vector<8x128xf32>
    tpu.vector_store %arg3[%c0_3, %c0_4], %2 {strides = array<i32>} : memref<8x128xf32, #tpu.memory_space<vmem>>, vector<8x128xf32>,
    return
  }
  func.func @transform_0(%arg0: i32) -> (i32, i32) {
    %c0_i32 = arith.constant 0 : i32
    %c0_i32_0 = arith.constant 0 : i32
    return %arg0, %c0_i32 : i32, i32
  }
  func.func @transform_1(%arg0: i32) -> (i32, i32) {
    %c0_i32 = arith.constant 0 : i32
    %c0_i32_0 = arith.constant 0 : i32
    return %arg0, %c0_i32 : i32, i32
  }
  func.func @transform_2(%arg0: i32) -> (i32, i32) {
    %c0_i32 = arith.constant 0 : i32
    %c0_i32_0 = arith.constant 0 : i32
    return %arg0, %c0_i32 : i32, i32
  }
}

</mosaic_0001>

<bundles_post_ra>
// kernel: tpu_custom_call.1
= control target key start
LH: loop header
LB: loop body
LE: loop exit
PB: predicated region body
PF: predicated region fallthrough
CT: control target
= control target key end

     0   :  { %7 = vsyncpa [#allocation3], 0  ;;  %s686_s0 = inlined_call_operand.hbm [shape: f32[16,128], index: 0, kind: input, shape index: {}]   ;;  %s687_s1 = inlined_call_operand.hbm [shape: f32[16,128], index: 1, kind: input, shape index: {}]   ;;  %s688_s2 = inlined_call_operand.hbm [shape: f32[16,128], index: 2, kind: output, shape index: {}]  }
   0x1   :  { %9 = vsyncpa [#allocation3 + $0x1], 0 }
   0x2   :  { %10 = vsyncpa [#allocation6], 0 }
   0x3   :  { %12 = vsyncpa [#allocation6 + $0x1], 0 }
   0x4   :  { %13 = vsyncpa [#allocation4], 0 }
   0x5   :  { %15 = vsyncpa [#allocation4 + $0x1], 0  ;;  %s526_s9 = smov 0   ;;  %s528_s10 = smov 0  }
   0x6   :  { %s530_s11 = smov 0   ;;  %s532_s12 = smov 0  }
   0x7 LB: > { %s547_s13 = sadd.s32 4294967295, %s509_s12   ;;  %s313_s14 = sadd.s32 4294967294, %s509_s12   ;;  %s509_s12 = sphi %s532_s12, %s699_s12   ;;  %s505_s11 = sphi %s530_s11, %s698_s11   ;;  %s501_s10 = sphi %s528_s10, %s697_s10   ;;  %s497_s9 = sphi %s526_s9, %s696_s9  }
   0x8   : > { %s551_s15 = sadd.s32 1, %s509_s12   ;;  %s28_s16 = sadd.s32 1, %s505_s11 }
   0x9   : > { %s25_s17 = ssub.s32 %s509_s12, %s551_s15  ;;  %p35_p0 = scmp.ne.s32.totalorder %s505_s11, %s501_s10 }
   0xa   : > { %p26_p1 = scmp.eq.s32.totalorder %s25_s17, 0  ;;  %p36_p2 = scmp.eq.s32.totalorder %s509_s12, 0 }
   0xb   : > { %p41_p3 = scmp.ne.s32.totalorder %s501_s10, %s497_s9  ;;  %p42_p4 = scmp.eq.s32.totalorder %s547_s13, 0 }
   0xc   : > { %s563_s18 = scalar_select %p26_p1, %s505_s11, %s28_s16  }
   0xd   : > { %p565_p5 = por %p36_p2, %p35_p0  ;;  %p569_p6 = por %p42_p4, %p41_p3 }
   0xe   : > { %p91_p7 = scmp.eq.s32.totalorder %s547_s13, 1  ;;  %p97_p8 = scmp.eq.s32.totalorder %s313_s14, 1 }
   0xf   : > { %p345_p10 = scmp.lt.s32.totalorder %s509_s12, 2  ;;  %s585_s23 = sand.u32 1, %s505_s11  }
  0x10   : > { %p576_p11 = por %p91_p7, %p35_p0  ;;  %p580_p12 = por %p97_p8, %p41_p3 }
  0x11   : > { %s317_s24 = sshll.u32 %s509_s12, 3  ;;  %s316_s25 = sshll.u32 %s585_s23, 3 }
  0x12   : > { %s125_s28 = scalar_lea.hbm %s686_s0, %s317_s24  ;;  %s121_s30 = scalar_lea.vmem [#allocation2], %s316_s25 }
  0x13   : > { %s127_s29 = sshll.u32 %s125_s28, 4  ;;  %s129_s3 = sshll.u32 %s121_s30, 4  ;;  %s128_s29 = int_to_ptr.hbm [resolvable:$true] %s127_s29  ;;  %s130_s3 = int_to_ptr.vmem [resolvable:$true] %s129_s3 }
  0x14   : > { %p594_p13 = pnand %p345_p10, %p565_p5  ;;  %p320_p0 = scmp.ge.s32.totalorder %s509_s12, 1 }
  0x15   : > { %p153_p1 = scmp.lt.s32.totalorder %s509_s12, 3  ;;  %s118_s5 = scalar_lea.sflag [#allocation3], %s585_s23 }
  0x16   : > { %s379_s6 = sshra.s32 %s128_s29, 4  ;;  %p383_p3 = pneg %p594_p13  ;;  %s380_s6 = int_to_ptr.hbm [resolvable:$true] %s379_s6 }
  0x17   : > { %s381_s7 = scalar_lea.hbm %s380_s6, 8  ;;  %s386_s16 = scalar_lea.hbm %s686_s0, 16 }
  0x18   : > { %p382_p2 = scmp.ne.s32.totalorder %s380_s6, %s381_s7  ;;  %p387_p5 = scmp.lt.s32.totalorder %s380_s6, %s686_s0 }
  0x19   : > { %p388_p8 = scmp.lt.s32.totalorder %s386_s16, %s381_s7 }
  0x1a   : > { %p384_p4 = pnand %p383_p3, %p382_p2 }
  0x1b   : > { %p389_p10 = por %p388_p8, %p387_p5 }
  0x1c   : > { %p385_p7 = pneg %p384_p4 }
  0x1e   : > { %p390_p9 = pnand %p389_p10, %p385_p7 }
  0x20   : > { %393 = shalt.err (!%p390_p9)
}
  0x21   : > { %337 = dma.hbm_to_vmem [thread:$0]  (!%p594_p13), %s128_s29, 128, %s130_s3, %s118_s5  }
  0x22   : > { %p618_p2 = pnand %p320_p0, %p153_p1  ;;  %s144_s30 = scalar_lea.hbm %s687_s1, %s317_s24 }
  0x23   : > { %s146_s6 = sshll.u32 %s144_s30, 4  ;;  %s140_s7 = scalar_lea.vmem [#allocation5], %s316_s25  ;;  %s147_s6 = int_to_ptr.hbm [resolvable:$true] %s146_s6 }
  0x24   : > { %s148_s8 = sshll.u32 %s140_s7, 4  ;;  %s137_s14 = scalar_lea.sflag [#allocation6], %s585_s23  ;;  %s149_s8 = int_to_ptr.vmem [resolvable:$true] %s148_s8 }
  0x25   : > { %s409_s16 = sshra.s32 %s147_s6, 4  ;;  %s416_s5 = scalar_lea.hbm %s687_s1, 16  ;;  %s410_s16 = int_to_ptr.hbm [resolvable:$true] %s409_s16 }
  0x26   : > { %s411_s17 = scalar_lea.hbm %s410_s16, 8  ;;  %p417_p4 = scmp.lt.s32.totalorder %s410_s16, %s687_s1 }
  0x27   : > { %p412_p9 = scmp.ne.s32.totalorder %s410_s16, %s411_s17  ;;  %p418_p7 = scmp.lt.s32.totalorder %s416_s5, %s411_s17 }
  0x29   : > { %p414_p0 = pnand %p412_p9, %p383_p3  ;;  %p419_p5 = por %p418_p7, %p417_p4 }
  0x2b   : > { %p415_p1 = pneg %p414_p0 }
  0x2d   : > { %p420_p8 = pnand %p419_p5, %p415_p1 }
  0x2f   : > { %423 = shalt.err (!%p420_p8)
}
  0x30   : > { %340 = dma.hbm_to_vmem [thread:$0]  (!%p594_p13), %s147_s6, 128, %s149_s8, %s137_s14  }
  0x31   : > { %157 = sbr.rel (%p618_p2) target bundleno = 72 (0x48), region = 28  ;;  %s640_s23 = sand.u32 (!%p618_p2), 1, %s501_s10  }
  0x32   : > { %s321_s25 = sshll.u32 (!%p618_p2), %s640_s23, 3  ;;  %s160_s27 = scalar_lea.sflag (!%p618_p2), [#allocation3], %s640_s23 }
  0x33   : > { %s163_s28 = scalar_lea.vmem (!%p618_p2), [#allocation2], %s321_s25 }
  0x36   : > { %484 = dma.done.wait (%p569_p6), %s160_s27, 128  }
  0x37   : > { %486 = vsyncadd (%p569_p6), %s160_s27, 4294967168  ;;  %s170_s4 = scalar_lea.sflag [#allocation6], %s640_s23  ;;  %s173_s30 = scalar_lea.vmem [#allocation5], %s321_s25 }
  0x38   : > { %488 = dma.done.wait (%p569_p6), %s170_s4, 128  }
  0x39   : > { %490 = vsyncadd (%p569_p6), %s170_s4, 4294967168  ;;  %s325_s26 = sshll.u32 %s547_s13, 3  ;;  %s199_s14 = scalar_lea.vmem [#allocation7], %s321_s25  ;;  %v200_v0 = vld [vmem:[%s163_s28] sm:$0xff]  ;;  %v201_v1 = vld [vmem:[%s173_s30] sm:$0xff] }
  0x3a   : > { %s215_s8 = scalar_lea.hbm %s688_s2, %s325_s26  ;;  %s217_s16 = sshll.u32 %s199_s14, 4  ;;  %v202_v2 = vadd.f32 %v201_v1, %v200_v0  ;;  %s218_s16 = int_to_ptr.vmem [resolvable:$true] %s217_s16 }
  0x3b   : > { %s219_s17 = sshll.u32 %s215_s8, 4  ;;  %s205_s29 = scalar_lea.sflag [#allocation4], %s640_s23  ;;  %s220_s17 = int_to_ptr.hbm [resolvable:$true] %s219_s17 }
  0x3c   : > { %203 = vst [vmem:[%s199_s14] sm:$0xff] %v202_v2  ;;  %s453_s20 = sshra.s32 %s220_s17, 4  ;;  %s459_s19 = scalar_lea.hbm %s688_s2, 16  ;;  %s454_s20 = int_to_ptr.hbm [resolvable:$true] %s453_s20 }
  0x3d   : > { %s455_s3 = scalar_lea.hbm %s454_s20, 8  ;;  %p460_p10 = scmp.lt.s32.totalorder %s454_s20, %s688_s2 }
  0x3e   : > { %p456_p6 = scmp.ne.s32.totalorder %s454_s20, %s455_s3  ;;  %p461_p2 = scmp.lt.s32.totalorder %s459_s19, %s455_s3 }
  0x40   : > { %p457_p13 = pnand %p456_p6, %p576_p11  ;;  %p462_p9 = por %p461_p2, %p460_p10 }
  0x42   : > { %p458_p3 = pneg %p457_p13 }
  0x44   : > { %p463_p0 = pnand %p462_p9, %p458_p3 }
  0x46   : > { %466 = shalt.err (!%p463_p0)
}
  0x47   : > { %332 = dma.vmem_to_hbm [thread:$0]  (%p576_p11), %s218_s16, 128, %s220_s17, %s205_s29  }
  0x48 PF: > { %s231_s23 = sand.u32 1, %s497_s9   ;;  %p695_p1 = scmp.ge.s32.totalorder %s509_s12, 2 }
  0x49   : > { %s232_s27 = scalar_lea.sflag [#allocation4], %s231_s23 }
  0x4a   : > { %p342_p4 = pnand %p695_p1, %p580_p12 }
  0x4c   : > { %p343_p7 = pneg %p342_p4 }
  0x4e   : > { %492 = dma.done.wait (%p343_p7), %s232_s27, 128  }
  0x4f   : > { %494 = vsyncadd (%p343_p7), %s232_s27, 4294967168  ;;  %p18_p5 = scmp.ge.s32.totalorder %s551_s15, 4   ;;  %s696_s9 = smov %s501_s10 }
  0x50   : > { %s697_s10 = smov %s505_s11  ;;  %s698_s11 = smov %s563_s18 }
  0x51   : > { %s699_s12 = smov %s551_s15  ;;  %20 = sbr.rel (!%p18_p5) target bundleno = 7 (0x7), region = 86 }
  0x56   :  { %238 = vsyncpa [#allocation3], 1 }
  0x57   :  { %240 = vsyncpa [#allocation3 + $0x1], 1 }
  0x58   :  { %241 = vsyncpa [#allocation6], 1 }
  0x59   :  { %243 = vsyncpa [#allocation6 + $0x1], 1 }
  0x5a   :  { %244 = vsyncpa [#allocation4], 1 }
  0x5b   :  { %246 = vsyncpa [#allocation4 + $0x1], 1 }

</bundles_post_ra>
